<compile_context>
chip_gen: v5e
topology: v5e:2x2
jax: 0.10.0
libtpu: 0.0.40
codegen_flags: <defaults>
</compile_context>

<pallas_src>
import jax
import jax.numpy as jnp
from jax.experimental import pallas as pl
from jax.experimental.pallas import tpu as pltpu

H1, H2 = 256, 128  # hidden widths of the Critic MLP


def _round_up(x, m):
    return ((x + m - 1) // m) * m


def _critic_kernel(x_ref, w1_ref, b1_ref, w2_ref, b2_ref, w3_ref, b3_ref, o_ref):
    """Feature-major MLP: batch on the lane axis, weights in (out, in) layout."""
    x = x_ref[...].astype(jnp.bfloat16)                               # (d_in, TB)

    # Layer 1 — single K=d_in matmul (the concat was fused by the wrapper).
    h1 = jnp.dot(w1_ref[...], x, preferred_element_type=jnp.float32) + b1_ref[...]
    h1 = jnp.maximum(h1, 0.0)                                         # (H1, TB) f32

    # Layer 2.
    h2 = jnp.dot(w2_ref[...], h1.astype(jnp.bfloat16),
                 preferred_element_type=jnp.float32) + b2_ref[...]
    h2 = jnp.maximum(h2, 0.0)                                         # (H2, TB) f32

    # Layer 3 (out_features == 1): (1, H2) @ (H2, TB) -> lane-dense (1, TB) row.
    out = jnp.dot(w3_ref[...], h2, preferred_element_type=jnp.float32) + b3_ref[...]

    o_ref[...] = out.reshape(o_ref.shape).astype(o_ref.dtype)


def _choose_tile(batch, block_rows):
    """Pick (lane-axis batch tile, padded batch).

    Single tile for small batches (tile == full lane dim, so the lane-alignment
    constraint is satisfied by "equals the full array dim").  For larger batches
    the tile is a multiple of 128 and small enough that the grid has >= 2 steps,
    so v7x's two TensorCores both get work (harmless on v5e/v6e).
    """
    b8 = _round_up(batch, 8)
    if b8 <= 256:
        return b8, b8
    block_rows = max(128, (block_rows // 128) * 128)
    n_tiles = max(2, pl.cdiv(b8, block_rows))
    tb = _round_up(pl.cdiv(b8, n_tiles), 128)
    return tb, _round_up(b8, tb)


def _vmem_bytes(d_in, tb):
    """Padded VMEM footprint: double-buffered I/O tiles + resident weights + temps."""
    lane = lambda n: _round_up(n, 128)
    sub = lambda n: _round_up(n, 8)
    io = 2 * sub(d_in) * lane(tb) * 4 + 2 * 8 * lane(tb) * 4
    weights = 2 * (sub(H1) * lane(d_in) * 2 + sub(H2) * lane(H1) * 2
                   + 8 * lane(H2) * 4
                   + (sub(H1) + sub(H2) + 8) * 128 * 4)                # biases (lane-padded)
    temps = lane(tb) * (sub(H1) * (4 + 2) + sub(H2) * 4 + sub(d_in) * 2)
    return io + weights + temps


def critic_forward(state, actions, params, *, block_rows=2048):
    """Fused Critic MLP forward as a single batch-tiled Pallas kernel.

    block_rows: target batch tile — sweep {1024, 2048, 4096} on production shapes.
    """
    w1, b1, w2, b2, w3, b3 = params
    B, state_dim = state.shape
    d_in = state_dim + actions.shape[1]

    # Fused concat + transpose to feature-major (d_in, B).  Tiny HBM cost and it
    # turns layer 1 into one K=d_in dot fed by one wide DMA stream.  Inputs may
    # already be bf16 (the kernel's cast then becomes a no-op).
    x_t = jnp.concatenate([state, actions], axis=1).T

    tb, b_pad = _choose_tile(B, block_rows)
    if b_pad != B:
        # Keep this an explicit zero pad: padded batch columns compute harmless
        # bias-only values that are sliced off below.
        x_t = jnp.pad(x_t, ((0, 0), (0, b_pad - B)))
    num_tiles = b_pad // tb

    flops = 2 * b_pad * (d_in * H1 + H1 * H2 + H2)
    bytes_accessed = (b_pad * d_in * x_t.dtype.itemsize + b_pad * 4
                      + (H1 * d_in + H2 * H1) * 2 + (H1 + H2 + H2 + 1 + 1) * 4)

    resident = lambda arr: pl.BlockSpec(arr.shape, lambda i: (0, 0))

    out = pl.pallas_call(
        _critic_kernel,
        out_shape=jax.ShapeDtypeStruct((num_tiles, 1, tb), jnp.float32),
        grid=(num_tiles,),
        in_specs=[
            # Batch-tiled input.  If input DMA ever shows up exposed at large tb,
            # add pipeline_mode=pl.Buffered(3) here (default depth-2 is usually
            # enough at tb >= 1024).
            pl.BlockSpec((d_in, tb), lambda i: (0, i)),
            resident(w1), resident(b1),
            resident(w2), resident(b2),
            resident(w3), resident(b3),
        ],
        out_specs=pl.BlockSpec((1, 1, tb), lambda i: (i, 0, 0)),  # lane-dense row
        compiler_params=pltpu.CompilerParams(
            dimension_semantics=("parallel",),
            vmem_limit_bytes=min(64 * 1024 * 1024,
                                 max(32 * 1024 * 1024, 2 * _vmem_bytes(d_in, tb))),
        ),
        cost_estimate=pl.CostEstimate(
            flops=flops, transcendentals=0, bytes_accessed=bytes_accessed),
    )(x_t, w1, b1, w2, b2, w3, b3)

    return out.reshape(b_pad, 1)[:B]


def init_critic_params(key, state_dim, action_dim, num_agents):
    """PyTorch-style uniform(+-1/sqrt(fan_in)) init, in kernel (out, in) layout."""
    total_actions = num_agents * action_dim
    d_in = state_dim + total_actions
    keys = jax.random.split(key, 6)

    def u(k, shape, fan_in):
        bound = 1.0 / float(fan_in) ** 0.5
        return jax.random.uniform(k, shape, jnp.float32, -bound, bound)

    # Same orientation as nn.Linear.weight: (out_features, in_features).
    w1 = u(keys[0], (H1, d_in), d_in).astype(jnp.bfloat16)
    b1 = u(keys[1], (H1, 1), d_in)
    w2 = u(keys[2], (H2, H1), H1).astype(jnp.bfloat16)
    b2 = u(keys[3], (H2, 1), H1)
    w3 = u(keys[4], (1, H2), H2)
    b3 = u(keys[5], (1, 1), H2)
    return (w1, b1, w2, b2, w3, b3)


def critic_reference(state, actions, params):
    """Plain-JAX reference mirroring the kernel math (bf16 operands, f32 accum)."""
    w1, b1, w2, b2, w3, b3 = params
    x = jnp.concatenate([state, actions], axis=1).astype(jnp.bfloat16)
    h1 = jnp.dot(x, w1.T, preferred_element_type=jnp.float32) + b1.T
    h1 = jnp.maximum(h1, 0.0)
    h2 = jnp.dot(h1.astype(jnp.bfloat16), w2.T,
                 preferred_element_type=jnp.float32) + b2.T
    h2 = jnp.maximum(h2, 0.0)
    return jnp.dot(h2, w3.T, preferred_element_type=jnp.float32) + b3


if __name__ == "__main__":
    # Small, forward-consistent shapes.
    B, state_dim, action_dim, num_agents = 8, 16, 4, 2
    total_actions = num_agents * action_dim

    key = jax.random.PRNGKey(0)
    kp, ks, ka = jax.random.split(key, 3)

    params = init_critic_params(kp, state_dim, action_dim, num_agents)
    state = jax.random.normal(ks, (B, state_dim), jnp.float32)
    actions = jax.random.normal(ka, (B, total_actions), jnp.float32)

    out = jax.block_until_ready(critic_forward(state, actions, params))
    ref = critic_reference(state, actions, params)
    assert out.shape == (B, 1)
    assert jnp.allclose(out, ref, atol=1e-2, rtol=1e-2)

    # Also exercise the multi-tile (>= 2 grid steps) + batch-padding path.
    B2 = 300
    ks2, ka2 = jax.random.split(jax.random.PRNGKey(1))
    state2 = jax.random.normal(ks2, (B2, state_dim), jnp.float32)
    actions2 = jax.random.normal(ka2, (B2, total_actions), jnp.float32)
    out2 = jax.block_until_ready(critic_forward(state2, actions2, params))
    ref2 = critic_reference(state2, actions2, params)
    assert out2.shape == (B2, 1)
    assert jnp.allclose(out2, ref2, atol=1e-2, rtol=1e-2)

    print("KERNEL_OK")
</pallas_src>

<mosaic_0001>
module attributes {stable_mosaic.version = 11 : i64} {
  func.func @_critic_kernel(%arg0: i32, %arg1: memref<24x8xf32, #tpu.memory_space<vmem>>, %arg2: memref<256x24xbf16, #tpu.memory_space<vmem>>, %arg3: memref<256x1xf32, #tpu.memory_space<vmem>>, %arg4: memref<128x256xbf16, #tpu.memory_space<vmem>>, %arg5: memref<128x1xf32, #tpu.memory_space<vmem>>, %arg6: memref<1x128xf32, #tpu.memory_space<vmem>>, %arg7: memref<1x1xf32, #tpu.memory_space<vmem>>, %arg8: memref<1x1x8xf32, #tpu.memory_space<vmem>>) attributes {dimension_semantics = [#tpu.dimension_semantics<parallel>], iteration_bounds = array<i64: 1>, scalar_prefetch = 0 : i64, scratch_operands = 0 : i64, tpu.core_type = #tpu.core_type<tc>, window_params = [{transform_indices = @transform_0, window_bounds = array<i64: 24, 8>}, {pipeline_mode = #tpu.pipeline_mode<synchronous>, transform_indices = @transform_1, window_bounds = array<i64: 256, 24>}, {pipeline_mode = #tpu.pipeline_mode<synchronous>, transform_indices = @transform_2, window_bounds = array<i64: 256, 1>}, {pipeline_mode = #tpu.pipeline_mode<synchronous>, transform_indices = @transform_3, window_bounds = array<i64: 128, 256>}, {pipeline_mode = #tpu.pipeline_mode<synchronous>, transform_indices = @transform_4, window_bounds = array<i64: 128, 1>}, {pipeline_mode = #tpu.pipeline_mode<synchronous>, transform_indices = @transform_5, window_bounds = array<i64: 1, 128>}, {pipeline_mode = #tpu.pipeline_mode<synchronous>, transform_indices = @transform_6, window_bounds = array<i64: 1, 1>}, {transform_indices = @transform_7, window_bounds = array<i64: 1, 1, 8>}]} {
    %c0 = arith.constant 0 : index
    %c0_0 = arith.constant 0 : index
    %0 = vector.load %arg1[%c0, %c0_0] : memref<24x8xf32, #tpu.memory_space<vmem>>, vector<24x8xf32>
    %1 = arith.truncf %0 : vector<24x8xf32> to vector<24x8xbf16>
    %c0_1 = arith.constant 0 : index
    %c0_2 = arith.constant 0 : index
    %2 = vector.load %arg2[%c0_1, %c0_2] : memref<256x24xbf16, #tpu.memory_space<vmem>>, vector<256x24xbf16>
    %cst = arith.constant dense<0.000000e+00> : vector<256x8xf32>
    %3 = tpu.matmul %2, %1, %cst {dimension_numbers = #tpu.dot_dimension_numbers<[1], [0], [0], [1], [0, 0, 1, 1], [], []>} : vector<256x24xbf16>, vector<24x8xbf16>, vector<256x8xf32> -> vector<256x8xf32>
    %c0_3 = arith.constant 0 : index
    %c0_4 = arith.constant 0 : index
    %4 = vector.load %arg3[%c0_3, %c0_4] : memref<256x1xf32, #tpu.memory_space<vmem>>, vector<256x1xf32>
    %5 = vector.broadcast %4 : vector<256x1xf32> to vector<256x8xf32>
    %6 = arith.addf %3, %5 : vector<256x8xf32>
    %cst_5 = arith.constant 0.000000e+00 : f32
    %7 = vector.broadcast %cst_5 : f32 to vector<256x8xf32>
    %8 = arith.maximumf %6, %7 : vector<256x8xf32>
    %c0_6 = arith.constant 0 : index
    %c0_7 = arith.constant 0 : index
    %9 = vector.load %arg4[%c0_6, %c0_7] : memref<128x256xbf16, #tpu.memory_space<vmem>>, vector<128x256xbf16>
    %10 = arith.truncf %8 : vector<256x8xf32> to vector<256x8xbf16>
    %cst_8 = arith.constant dense<0.000000e+00> : vector<128x8xf32>
    %11 = tpu.matmul %9, %10, %cst_8 {dimension_numbers = #tpu.dot_dimension_numbers<[1], [0], [0], [1], [0, 0, 1, 1], [], []>} : vector<128x256xbf16>, vector<256x8xbf16>, vector<128x8xf32> -> vector<128x8xf32>
    %c0_9 = arith.constant 0 : index
    %c0_10 = arith.constant 0 : index
    %12 = vector.load %arg5[%c0_9, %c0_10] : memref<128x1xf32, #tpu.memory_space<vmem>>, vector<128x1xf32>
    %13 = vector.broadcast %12 : vector<128x1xf32> to vector<128x8xf32>
    %14 = arith.addf %11, %13 : vector<128x8xf32>
    %cst_11 = arith.constant 0.000000e+00 : f32
    %15 = vector.broadcast %cst_11 : f32 to vector<128x8xf32>
    %16 = arith.maximumf %14, %15 : vector<128x8xf32>
    %c0_12 = arith.constant 0 : index
    %c0_13 = arith.constant 0 : index
    %17 = vector.load %arg6[%c0_12, %c0_13] : memref<1x128xf32, #tpu.memory_space<vmem>>, vector<1x128xf32>
    %cst_14 = arith.constant dense<0.000000e+00> : vector<1x8xf32>
    %18 = tpu.matmul %17, %16, %cst_14 {dimension_numbers = #tpu.dot_dimension_numbers<[1], [0], [0], [1], [0, 0, 1, 1], [], []>} : vector<1x128xf32>, vector<128x8xf32>, vector<1x8xf32> -> vector<1x8xf32>
    %c0_15 = arith.constant 0 : index
    %c0_16 = arith.constant 0 : index
    %19 = vector.load %arg7[%c0_15, %c0_16] : memref<1x1xf32, #tpu.memory_space<vmem>>, vector<1x1xf32>
    %20 = vector.broadcast %19 : vector<1x1xf32> to vector<1x8xf32>
    %21 = arith.addf %18, %20 : vector<1x8xf32>
    %22 = vector.shape_cast %21 : vector<1x8xf32> to vector<1x1x8xf32>
    %c0_17 = arith.constant 0 : index
    %c0_18 = arith.constant 0 : index
    %c0_19 = arith.constant 0 : index
    %23 = vector.load %arg8[%c0_17, %c0_18, %c0_19] : memref<1x1x8xf32, #tpu.memory_space<vmem>>, vector<1x1x8xf32>
    tpu.vector_store %arg8[%c0_17, %c0_18, %c0_19], %22 {strides = array<i32>} : memref<1x1x8xf32, #tpu.memory_space<vmem>>, vector<1x1x8xf32>,
    return
  }
  func.func @transform_0(%arg0: i32) -> (i32, i32) {
    %c0_i32 = arith.constant 0 : i32
    %c0_i32_0 = arith.constant 0 : i32
    return %c0_i32, %arg0 : i32, i32
  }
  func.func @transform_1(%arg0: i32) -> (i32, i32) {
    %c0_i32 = arith.constant 0 : i32
    %c0_i32_0 = arith.constant 0 : i32
    %c0_i32_1 = arith.constant 0 : i32
    return %c0_i32, %c0_i32_0 : i32, i32
  }
  func.func @transform_2(%arg0: i32) -> (i32, i32) {
    %c0_i32 = arith.constant 0 : i32
    %c0_i32_0 = arith.constant 0 : i32
    %c0_i32_1 = arith.constant 0 : i32
    return %c0_i32, %c0_i32_0 : i32, i32
  }
  func.func @transform_3(%arg0: i32) -> (i32, i32) {
    %c0_i32 = arith.constant 0 : i32
    %c0_i32_0 = arith.constant 0 : i32
    %c0_i32_1 = arith.constant 0 : i32
    return %c0_i32, %c0_i32_0 : i32, i32
  }
  func.func @transform_4(%arg0: i32) -> (i32, i32) {
    %c0_i32 = arith.constant 0 : i32
    %c0_i32_0 = arith.constant 0 : i32
    %c0_i32_1 = arith.constant 0 : i32
    return %c0_i32, %c0_i32_0 : i32, i32
  }
  func.func @transform_5(%arg0: i32) -> (i32, i32) {
    %c0_i32 = arith.constant 0 : i32
    %c0_i32_0 = arith.constant 0 : i32
    %c0_i32_1 = arith.constant 0 : i32
    return %c0_i32, %c0_i32_0 : i32, i32
  }
  func.func @transform_6(%arg0: i32) -> (i32, i32) {
    %c0_i32 = arith.constant 0 : i32
    %c0_i32_0 = arith.constant 0 : i32
    %c0_i32_1 = arith.constant 0 : i32
    return %c0_i32, %c0_i32_0 : i32, i32
  }
  func.func @transform_7(%arg0: i32) -> (i32, i32, i32) {
    %c0_i32 = arith.constant 0 : i32
    %c0_i32_0 = arith.constant 0 : i32
    %c0_i32_1 = arith.constant 0 : i32
    return %arg0, %c0_i32, %c0_i32_0 : i32, i32, i32
  }
}

</mosaic_0001>

<bundles_post_ra>
// kernel: tpu_custom_call.1
= control target key start
LH: loop header
LB: loop body
LE: loop exit
PB: predicated region body
PF: predicated region fallthrough
CT: control target
= control target key end

     0   :  { %s1565_s0 = inlined_call_operand.vmem [shape: f32[24,8], index: 0, kind: input, shape index: {}]   ;;  %s1566_s1 = inlined_call_operand.vmem [shape: bf16[256,24], index: 1, kind: input, shape index: {}]   ;;  %s1567_s2 = inlined_call_operand.vmem [shape: f32[256,1], index: 2, kind: input, shape index: {}]   ;;  %s1568_s3 = inlined_call_operand.vmem [shape: bf16[128,256], index: 3, kind: input, shape index: {}]   ;;  %s1569_s4 = inlined_call_operand.vmem [shape: f32[128,1], index: 4, kind: input, shape index: {}]   ;;  %s1570_s5 = inlined_call_operand.vmem [shape: f32[1,128], index: 5, kind: input, shape index: {}]   ;;  %s1571_s6 = inlined_call_operand.<no memory space> [shape: f32[1,1], index: 6, kind: input, shape index: {}]   ;;  %s1572_s7 = inlined_call_operand.hbm [shape: f32[1,1,8], index: 7, kind: output, shape index: {}]  }
   0x1   :  { %v12_v0 = vstv %s1571_s6 }
   0x2   :  { %13 = vst [vmem:[#allocation2] sm:$0x1] %v12_v0 }
   0x3   :  { %v97_v1 = vld [vmem:[%s1567_s2 + $0xf0] sm:$0xff]  ;;  %v95_v2 = vld [vmem:[%s1567_s2 + $0xe0] sm:$0xff]  ;;  %v1090_v4 = vmov 0   ;;  %vm388_vm0 = vcmask 1043456   ;;  %v31_v8 = vld [vmem:[%s1565_s0 + $0x8] sm:$0xff] }
   0x4   :  { %v81_v3 = vld [vmem:[%s1567_s2 + $0x70] sm:$0xff]  ;;  %1063 = vset.pattern.permute.xlu2 %v1090_v4  ;;  %1062 = vset.pattern.permute.xlu1 %v1090_v4  ;;  %v30_v7 = vld [vmem:[%s1565_s0] sm:$0xff]  ;;  %v98_v11 = vld [vmem:[%s1567_s2 + $0xf8] sm:$0xff] }
   0x5   :  { %v32_v5 = vld [vmem:[%s1565_s0 + $0x10] sm:$0xff]  ;;  %1061 = vset.pattern.permute.xlu0 %v1090_v4  ;;  %241 = vperm.xlu2 %1063, %v95_v2   ;;  %v33_v10 = vpack.c.bf16 %v31_v8, %v30_v7  ;;  %v96_v12 = vld [vmem:[%s1567_s2 + $0xe8] sm:$0xff] }
   0x6   :  { %v34_v6 = vpack.c.bf16 %v32_v5, %v32_v5  ;;  %251 = vperm.xlu0 %1061, %v97_v1   ;;  %171 = vperm.xlu1 %1062, %v81_v3  }
   0x8   :  { %v390_v9 = vsel %vm388_vm0, %v34_v6, 0 }
   0x9   :  { %398 = vmatpush.bf16.msra.mxu0 %v390_v9  ;;  %1057 = vmatpush.bf16.msra.mxu3 %v390_v9 }
   0xa   :  { %14 = vsyncpa [#allocation4], 0  ;;  %v82_v13 = vld [vmem:[%s1567_s2 + $0x78] sm:$0xff]  ;;  %v1025_v14 = vld [vmem:[%s1566_s1] sm:$0xff]  ;;  %vm339_vm1 = vcmask 195584   ;;  %s1091_s16 = smov [#allocation3]  }
   0xb   :  { %v1034_v15 = vld [vmem:[%s1566_s1 + $0x48] sm:$0xff]  ;;  %v93_v16 = vld [vmem:[%s1567_s2 + $0xd0] sm:$0xff]  ;;  %v79_v18 = vld [vmem:[%s1567_s2 + $0x60] sm:$0xff]  ;;  %s870_s17 = sshll.u32 %s1091_s16, 4  ;;  %s872_s0 = sshll.u32 %s1572_s7, 4  ;;  %vm863_vm2 = vcmask 57344   ;;  %s871_s17 = int_to_ptr.vmem [resolvable:$true] %s870_s17  ;;  %s873_s0 = int_to_ptr.hbm [resolvable:$true] %s872_s0 }
   0xc   :  { %v80_v17 = vld [vmem:[%s1567_s2 + $0x68] sm:$0xff]  ;;  %v94_v19 = vld [vmem:[%s1567_s2 + $0xd8] sm:$0xff]  ;;  %v77_v21 = vld [vmem:[%s1567_s2 + $0x50] sm:$0xff] }
   0xd   :  { %399 = vmatpush.bf16.msra.mxu0 %v33_v10  ;;  %1058 = vmatpush.bf16.msra.mxu3 %v33_v10  ;;  %v78_v20 = vld [vmem:[%s1567_s2 + $0x58] sm:$0xff]  ;;  %v1026_v22 = vld [vmem:[%s1566_s1 + $0x8] sm:$0xff]  ;;  %v1035_v23 = vld [vmem:[%s1566_s1 + $0x50] sm:$0xff] }
   0xe   :  { %246 = vperm.xlu2 %1063, %v96_v12   ;;  %256 = vperm.xlu0 %1061, %v98_v11   ;;  %v75_v24 = vld [vmem:[%s1567_s2 + $0x40] sm:$0xff]  ;;  %v92_v26 = vld [vmem:[%s1567_s2 + $0xc8] sm:$0xff]  ;;  %v89_v27 = vld [vmem:[%s1567_s2 + $0xb0] sm:$0xff] }
   0xf   :  { %176 = vperm.xlu1 %1062, %v82_v13   ;;  %v91_v25 = vld [vmem:[%s1567_s2 + $0xc0] sm:$0xff]  ;;  %v90_v28 = vld [vmem:[%s1567_s2 + $0xb8] sm:$0xff]  ;;  %v76_v29 = vld [vmem:[%s1567_s2 + $0x48] sm:$0xff] }
  0x10   :  { %945 = vmatmul.msk.bf16.vlgmr.msra.gmra.mxu0 %vm339_vm1, %v1025_v14  ;;  %954 = vmatmul.msk.bf16.vlgmr.msra.gmra.mxu3 %vm339_vm1, %v1034_v15  ;;  %v1027_v30 = vld [vmem:[%s1566_s1 + $0x10] sm:$0xff]  ;;  %v1036_v31 = vld [vmem:[%s1566_s1 + $0x58] sm:$0xff]  ;;  %v87_v32 = vld [vmem:[%s1567_s2 + $0xa0] sm:$0xff] }
  0x11   :  { %v74_v33 = vld [vmem:[%s1567_s2 + $0x38] sm:$0xff]  ;;  %v73_v34 = vld [vmem:[%s1567_s2 + $0x30] sm:$0xff]  ;;  %v88_v35 = vld [vmem:[%s1567_s2 + $0xa8] sm:$0xff] }
  0x12   :  { %v72_v36 = vld [vmem:[%s1567_s2 + $0x28] sm:$0xff]  ;;  %v71_v37 = vld [vmem:[%s1567_s2 + $0x20] sm:$0xff]  ;;  %v1028_v38 = vld [vmem:[%s1566_s1 + $0x18] sm:$0xff] }
  0x13   :  { %v1037_v39 = vld [vmem:[%s1566_s1 + $0x60] sm:$0xff]  ;;  %v69_v40 = vld [vmem:[%s1567_s2 + $0x10] sm:$0xff]  ;;  %v86_v42 = vld [vmem:[%s1567_s2 + $0x98] sm:$0xff] }
  0x14   :  { %v85_v41 = vld [vmem:[%s1567_s2 + $0x90] sm:$0xff]  ;;  %v83_v43 = vld [vmem:[%s1567_s2 + $0x80] sm:$0xff]  ;;  %v84_v44 = vld [vmem:[%s1567_s2 + $0x88] sm:$0xff] }
  0x15   :  { %v70_v45 = vld [vmem:[%s1567_s2 + $0x18] sm:$0xff]  ;;  %v1029_v46 = vld [vmem:[%s1566_s1 + $0x20] sm:$0xff]  ;;  %v1038_v47 = vld [vmem:[%s1566_s1 + $0x68] sm:$0xff] }
  0x16   :  { %231 = vperm.xlu2 %1063, %v93_v16   ;;  %161 = vperm.xlu0 %1061, %v79_v18   ;;  %v560_v48 = vld [vmem:[%s1569_s4 + $0x78] sm:$0xff]  ;;  %v68_v49 = vld [vmem:[%s1567_s2 + $0x8] sm:$0xff]  ;;  %v67_v50 = vld [vmem:[%s1567_s2] sm:$0xff] }
  0x17   :  { %166 = vperm.xlu1 %1062, %v80_v17   ;;  %v557_v51 = vld [vmem:[%s1569_s4 + $0x60] sm:$0xff]  ;;  %v558_v52 = vld [vmem:[%s1569_s4 + $0x68] sm:$0xff]  ;;  %v559_v53 = vld [vmem:[%s1569_s4 + $0x70] sm:$0xff] }
  0x18   :  { %v1030_v54 = vld [vmem:[%s1566_s1 + $0x28] sm:$0xff]  ;;  %v1039_v55 = vld [vmem:[%s1566_s1 + $0x70] sm:$0xff]  ;;  %v556_v58 = vld [vmem:[%s1569_s4 + $0x58] sm:$0xff] }
  0x19   :  { %v554_v56 = vld [vmem:[%s1569_s4 + $0x48] sm:$0xff]  ;;  %v555_v57 = vld [vmem:[%s1569_s4 + $0x50] sm:$0xff]  ;;  %v552_v60 = vld [vmem:[%s1569_s4 + $0x38] sm:$0xff] }
  0x1a   :  { %v551_v59 = vld [vmem:[%s1569_s4 + $0x30] sm:$0xff]  ;;  %v553_v62 = vld [vmem:[%s1569_s4 + $0x40] sm:$0xff]  ;;  %v1040_v0 = vld [vmem:[%s1566_s1 + $0x78] sm:$0xff] }
  0x1b   :  { %v1031_v63 = vld [vmem:[%s1566_s1 + $0x30] sm:$0xff]  ;;  %v548_v1 = vld [vmem:[%s1569_s4 + $0x18] sm:$0xff]  ;;  %v549_v2 = vld [vmem:[%s1569_s4 + $0x20] sm:$0xff] }
  0x1c   :  { %v550_v3 = vld [vmem:[%s1569_s4 + $0x28] sm:$0xff]  ;;  %v545_v7 = vld [vmem:[%s1569_s4] sm:$0xff]  ;;  %v547_v9 = vld [vmem:[%s1569_s4 + $0x10] sm:$0xff] }
  0x1d   :  { %v546_v8 = vld [vmem:[%s1569_s4 + $0x8] sm:$0xff]  ;;  %v1032_v10 = vld [vmem:[%s1566_s1 + $0x38] sm:$0xff]  ;;  %v836_v14 = vld [vmem:[#allocation2] sm:$0x1] }
  0x1e   :  { %156 = vperm.xlu2 %1063, %v78_v20   ;;  %236 = vperm.xlu0 %1061, %v94_v19   ;;  %v1033_v18 = vld [vmem:[%s1566_s1 + $0x40] sm:$0xff] }
  0x1f   :  { %151 = vperm.xlu1 %1062, %v77_v21  }
  0x20   :  { %946 = vmatmul.msk.bf16.gmra.mxu0 %vm339_vm1, %v1026_v22  ;;  %955 = vmatmul.msk.bf16.gmra.mxu3 %vm339_vm1, %v1035_v23 }
  0x26   :  { %141 = vperm.xlu2 %1063, %v75_v24   ;;  %221 = vperm.xlu0 %1061, %v91_v25  }
  0x27   :  { %226 = vperm.xlu1 %1062, %v92_v26  }
  0x2e   :  { %216 = vperm.xlu2 %1063, %v90_v28   ;;  %146 = vperm.xlu0 %1061, %v76_v29  }
  0x2f   :  { %211 = vperm.xlu1 %1062, %v89_v27  }
  0x30   :  { %947 = vmatmul.msk.bf16.gmra.mxu0 %vm339_vm1, %v1027_v30  ;;  %956 = vmatmul.msk.bf16.gmra.mxu3 %vm339_vm1, %v1036_v31 }
  0x36   :  { %201 = vperm.xlu2 %1063, %v87_v32   ;;  %131 = vperm.xlu0 %1061, %v73_v34  }
  0x37   :  { %136 = vperm.xlu1 %1062, %v74_v33  }
  0x3e   :  { %126 = vperm.xlu2 %1063, %v72_v36   ;;  %206 = vperm.xlu0 %1061, %v88_v35  }
  0x3f   :  { %121 = vperm.xlu1 %1062, %v71_v37  }
  0x40   :  { %948 = vmatmul.msk.bf16.gmra.mxu0 %vm339_vm1, %v1028_v38  ;;  %957 = vmatmul.msk.bf16.gmra.mxu3 %vm339_vm1, %v1037_v39 }
  0x46   :  { %111 = vperm.xlu2 %1063, %v69_v40   ;;  %191 = vperm.xlu0 %1061, %v85_v41  }
  0x47   :  { %196 = vperm.xlu1 %1062, %v86_v42  }
  0x4e   :  { %186 = vperm.xlu2 %1063, %v84_v44   ;;  %116 = vperm.xlu0 %1061, %v70_v45  }
  0x4f   :  { %181 = vperm.xlu1 %1062, %v83_v43  }
  0x50   :  { %949 = vmatmul.msk.bf16.gmra.mxu0 %vm339_vm1, %v1029_v46  ;;  %958 = vmatmul.msk.bf16.gmra.mxu3 %vm339_vm1, %v1038_v47 }
  0x56   :  { %638 = vperm.xlu2 %1063, %v560_v48   ;;  %101 = vperm.xlu0 %1061, %v67_v50  }
  0x57   :  { %106 = vperm.xlu1 %1062, %v68_v49  }
  0x5e   :  { %623 = vperm.xlu2 %1063, %v557_v51   ;;  %633 = vperm.xlu0 %1061, %v559_v53  }
  0x5f   :  { %628 = vperm.xlu1 %1062, %v558_v52   ;;  %v1315_v61 = vpop.permute.xlu2 %241 }
  0x60   :  { %950 = vmatmul.msk.bf16.gmra.mxu0 %vm339_vm1, %v1030_v54  ;;  %959 = vmatmul.msk.bf16.gmra.mxu3 %vm339_vm1, %v1039_v55 }
  0x66   :  { %608 = vperm.xlu2 %1063, %v554_v56   ;;  %618 = vperm.xlu0 %1061, %v556_v58  }
  0x67   :  { %613 = vperm.xlu1 %1062, %v555_v57  }
  0x68   :  { %v1337_v4 = vpop.permute.xlu2 %246 }
  0x6e   :  { %593 = vperm.xlu2 %1063, %v551_v59   ;;  %603 = vperm.xlu0 %1061, %v553_v62  }
  0x6f   :  { %598 = vperm.xlu1 %1062, %v552_v60  }
  0x70   :  { %951 = vmatmul.msk.bf16.gmra.mxu0 %vm339_vm1, %v1031_v63  ;;  %960 = vmatmul.msk.bf16.gmra.mxu3 %vm339_vm1, %v1040_v0  ;;  %v1355_v11 = vpop.permute.xlu2 %231 }
  0x76   :  { %578 = vperm.xlu2 %1063, %v548_v1   ;;  %588 = vperm.xlu0 %1061, %v550_v3  }
  0x77   :  { %583 = vperm.xlu1 %1062, %v549_v2  }
  0x78   :  { %v1339_v5 = vpop.permute.xlu0 %251  ;;  %v1341_v6 = vpop.permute.xlu1 %171 }
  0x79   :  { %v1366_v17 = vpop.permute.xlu2 %156 }
  0x7e   :  { %563 = vperm.xlu2 %1063, %v545_v7   ;;  %573 = vperm.xlu0 %1061, %v547_v9  }
  0x7f   :  { %568 = vperm.xlu1 %1062, %v546_v8  }
  0x80   :  { %952 = vmatmul.msk.bf16.gmra.mxu0 %vm339_vm1, %v1032_v10  ;;  %v1358_v12 = vpop.permute.xlu0 %256 }
  0x81   :  { %v1360_v13 = vpop.permute.xlu1 %176  ;;  %v1378_v23 = vpop.permute.xlu2 %141 }
  0x86   :  { %839 = vperm.xlu0 %1061, %v836_v14  }
  0x88   :  { %v1364_v16 = vpop.permute.xlu0 %161 }
  0x89   :  { %v1362_v15 = vpop.permute.xlu1 %166  ;;  %v217_v29 = vpop.permute.xlu2 %216 }
  0x8d   :  { %v1371_v19 = vpop.f32.mrf.mxu0 }
  0x90   :  { %953 = vmatmul.msk.bf16.gmra.mxu0 %vm339_vm1, %v1033_v18  ;;  %v1374_v20 = vpop.permute.xlu0 %236 }
  0x91   :  { %v1376_v21 = vpop.permute.xlu1 %151  ;;  %v202_v34 = vpop.permute.xlu2 %201 }
  0x93   :  { %v446_v22 = vpop.f32.mrf.mxu3 }
  0x95   :  { %v403_v24 = vpop.f32.mrf.mxu0 }
  0x98   :  { %v1380_v25 = vpop.permute.xlu0 %221 }
  0x99   :  { %v1382_v26 = vpop.permute.xlu1 %226  ;;  %v127_v43 = vpop.permute.xlu2 %126 }
  0x9b   :  { %v448_v27 = vpop.f32.mrf.mxu3 }
  0x9d   :  { %v406_v28 = vpop.f32.mrf.mxu0 }
  0xa0   :  { %v1384_v31 = vpop.permute.xlu0 %146 }
  0xa1   :  { %v212_v30 = vpop.permute.xlu1 %211  ;;  %v112_v0 = vpop.permute.xlu2 %111 }
  0xa2   :  { %v407_v8 = vadd.f32 %v406_v28, %v112_v0 }
  0xa3   :  { %v451_v32 = vpop.f32.mrf.mxu3 }
  0xa4   :  { %v452_v39 = vadd.f32 %v451_v32, %v202_v34 }
  0xa5   :  { %v408_v33 = vpop.f32.mrf.mxu0 }
  0xa6   :  { %v501_v45 = vmax.f32 %v452_v39, 0.0 }
  0xa8   :  { %v132_v36 = vpop.permute.xlu0 %131 }
  0xa9   :  { %v137_v35 = vpop.permute.xlu1 %136 }
  0xab   :  { %v453_v37 = vpop.f32.mrf.mxu3 }
  0xad   :  { %v411_v38 = vpop.f32.mrf.mxu0 }
  0xb0   :  { %v207_v40 = vpop.permute.xlu0 %206 }
  0xb1   :  { %v122_v41 = vpop.permute.xlu1 %121  ;;  %v454_v42 = vadd.f32 %v453_v37, %v207_v40 }
  0xb2   :  { %v412_v47 = vadd.f32 %v411_v38, %v122_v41 }
  0xb3   :  { %v456_v44 = vpop.f32.mrf.mxu3  ;;  %v502_v46 = vmax.f32 %v454_v42, 0.0 }
  0xb4   :  { %v485_v51 = vmax.f32 %v412_v47, 0.0  ;;  %v457_v55 = vadd.f32 %v456_v44, %v212_v30 }
  0xb5   :  { %v413_v48 = vpop.f32.mrf.mxu0  ;;  %v1386_v50 = vpack.c.bf16 %v502_v46, %v501_v45 }
  0xb6   :  { %v414_v49 = vadd.f32 %v413_v48, %v127_v43  ;;  %v503_v2 = vmax.f32 %v457_v55, 0.0 }
  0xb8   :  { %v486_v52 = vmax.f32 %v414_v49, 0.0  ;;  %v192_v53 = vpop.permute.xlu0 %191 }
  0xb9   :  { %v197_v54 = vpop.permute.xlu1 %196  ;;  %v447_v56 = vadd.f32 %v446_v22, %v192_v53 }
  0xba   :  { %v449_v57 = vadd.f32 %v448_v27, %v197_v54  ;;  %v1388_v58 = vpack.c.bf16 %v486_v52, %v485_v51  ;;  %v483_v27 = vmax.f32 %v407_v8, 0.0 }
  0xbb   :  { %v458_v59 = vpop.f32.mrf.mxu3  ;;  %v499_v60 = vmax.f32 %v447_v56, 0.0 }
  0xbc   :  { %v500_v62 = vmax.f32 %v449_v57, 0.0  ;;  %v459_v63 = vadd.f32 %v458_v59, %v217_v29 }
  0xbd   :  { %v416_v1 = vpop.f32.mrf.mxu0 }
  0xbe   :  { %v504_v3 = vmax.f32 %v459_v63, 0.0  ;;  %v1390_v7 = vpack.c.bf16 %v500_v62, %v499_v60  ;;  %v417_v30 = vadd.f32 %v416_v1, %v132_v36 }
  0xc0   :  { %v1392_v9 = vpack.c.bf16 %v504_v3, %v503_v2  ;;  %v117_v14 = vpop.permute.xlu0 %116  ;;  %v487_v38 = vmax.f32 %v417_v30, 0.0 }
  0xc1   :  { %v1394_v10 = vpop.permute.xlu1 %181  ;;  %v409_v18 = vadd.f32 %v408_v33, %v117_v14 }
  0xc3   :  { %v461_v22 = vpop.f32.mrf.mxu3  ;;  %v484_v32 = vmax.f32 %v409_v18, 0.0 }
  0xc4   :  { %v462_v30 = vadd.f32 %v461_v22, %v1380_v25 }
  0xc5   :  { %v418_v34 = vpop.f32.mrf.mxu0  ;;  %v1396_v29 = vpack.c.bf16 %v484_v32, %v483_v27 }
  0xc6   :  { %v419_v37 = vadd.f32 %v418_v34, %v137_v35 }
  0xc8   :  { %v488_v39 = vmax.f32 %v419_v37, 0.0  ;;  %v102_v41 = vpop.permute.xlu0 %101 }
  0xc9   :  { %v107_v40 = vpop.permute.xlu1 %106  ;;  %v402_v28 = vadd.f32 %v1371_v19, %v102_v41 }
  0xca   :  { %v404_v42 = vadd.f32 %v403_v24, %v107_v40  ;;  %v1399_v43 = vpack.c.bf16 %v488_v39, %v487_v38 }
  0xcb   :  { %v463_v44 = vpop.f32.mrf.mxu3  ;;  %v481_v33 = vmax.f32 %v402_v28, 0.0 }
  0xcc   :  { %v482_v45 = vmax.f32 %v404_v42, 0.0 }
  0xcd   :  { %v421_v46 = vpop.f32.mrf.mxu0 }
  0xce   :  { %v1401_v47 = vpack.c.bf16 %v482_v45, %v481_v33 }
  0xd3   :  { %v466_v36 = vpop.f32.mrf.mxu3 }
  0xd4   :  { %v467_v8 = vadd.f32 %v466_v36, %v1355_v11 }
  0xd5   :  { %v423_v48 = vpop.f32.mrf.mxu0 }
  0xdb   :  { %v468_v35 = vpop.f32.mrf.mxu3 }
  0xdc   :  { %v469_v1 = vadd.f32 %v468_v35, %v1374_v20 }
  0xdd   :  { %v426_v49 = vpop.f32.mrf.mxu0 }
  0xde   :  { %v508_v18 = vmax.f32 %v469_v1, 0.0  ;;  %v427_v25 = vadd.f32 %v426_v49, %v1376_v21  ;;  %v187_v21 = vpop.permute.xlu2 %186  ;;  %v987_v1 = vld [vmem:[%s1568_s3 + $0x30] sm:$0xf] }
  0xe0   :  { %v491_v45 = vmax.f32 %v427_v25, 0.0  ;;  %v1515_v25 = vpop.permute.xlu1 %628 }
  0xe3   :  { %v471_v51 = vpop.f32.mrf.mxu3 }
  0xe4   :  { %v472_v62 = vadd.f32 %v471_v51, %v1315_v61  ;;  %v507_v61 = vmax.f32 %v467_v8, 0.0  ;;  %v1049_v8 = vld [vmem:[%s1568_s3 + $0x44] sm:$0xf] }
  0xe5   :  { %v428_v52 = vpop.f32.mrf.mxu0 }
  0xe6   :  { %v509_v14 = vmax.f32 %v472_v62, 0.0  ;;  %v542_v39 = vpack.c.bf16 %v508_v18, %v507_v61  ;;  %v429_v40 = vadd.f32 %v428_v52, %v1366_v17  ;;  %v1047_v62 = vld [vmem:[%s1568_s3 + $0x34] sm:$0xf]  ;;  %v995_v18 = vld [vmem:[%s1568_s3 + $0x40] sm:$0xf] }
  0xe8   :  { %v492_v28 = vmax.f32 %v429_v40, 0.0  ;;  %v1011_v40 = vld [vmem:[%s1568_s3 + $0x60] sm:$0xf] }
  0xea   :  { %v534_v17 = vpack.c.bf16 %v492_v28, %v491_v45  ;;  %v1525_v28 = vpop.permute.xlu0 %633  ;;  %v1019_v45 = vld [vmem:[%s1568_s3 + $0x70] sm:$0xf] }
  0xeb   :  { %v473_v53 = vpop.f32.mrf.mxu3 }
  0xec   :  { %v474_v57 = vadd.f32 %v473_v53, %v1337_v4 }
  0xed   :  { %v431_v54 = vpop.f32.mrf.mxu0 }
  0xee   :  { %v510_v2 = vmax.f32 %v474_v57, 0.0  ;;  %v432_v11 = vadd.f32 %v431_v54, %v1364_v16  ;;  %v971_v54 = vld [vmem:[%s1568_s3 + $0x10] sm:$0xf]  ;;  %v979_v57 = vld [vmem:[%s1568_s3 + $0x20] sm:$0xf] }
  0xf0   :  { %v543_v27 = vpack.c.bf16 %v510_v2, %v509_v14  ;;  %v493_v22 = vmax.f32 %v432_v11, 0.0  ;;  %v1048_v2 = vld [vmem:[%s1568_s3 + $0x34] sm:$0xf0]  ;;  %v997_v14 = vld [vmem:[%s1568_s3 + $0x48] sm:$0xf0] }
  0xf3   :  { %v476_v55 = vpop.f32.mrf.mxu3 }
  0xf4   :  { %v477_v19 = vadd.f32 %v476_v55, %v1339_v5  ;;  %v464_v5 = vadd.f32 %v463_v44, %v1382_v26  ;;  %v505_v26 = vmax.f32 %v462_v30, 0.0  ;;  %v422_v44 = vadd.f32 %v421_v46, %v1378_v23  ;;  %v1041_v23 = vld [vmem:[%s1568_s3 + $0x4] sm:$0xf]  ;;  %v1044_v55 = vld [vmem:[%s1568_s3 + $0x14] sm:$0xf0] }
  0xf5   :  { %v433_v24 = vpop.f32.mrf.mxu0  ;;  %v1005_v30 = vld [vmem:[%s1568_s3 + $0x58] sm:$0xf0] }
  0xf6   :  { %v511_v63 = vmax.f32 %v477_v19, 0.0  ;;  %v434_v32 = vadd.f32 %v433_v24, %v1362_v15  ;;  %v506_v34 = vmax.f32 %v464_v5, 0.0  ;;  %v489_v36 = vmax.f32 %v422_v44, 0.0  ;;  %v1045_v24 = vld [vmem:[%s1568_s3 + $0x24] sm:$0xf] }
  0xf7   :  { %v981_v19 = vld [vmem:[%s1568_s3 + $0x28] sm:$0xf0]  ;;  %v1000_v5 = vor.u32 %v1049_v8, %v997_v14 }
  0xf8   :  { %v541_v15 = vpack.c.bf16 %v506_v34, %v505_v26  ;;  %v1499_v34 = vpop.permute.xlu2 %638 }
  0xfb   :  { %v478_v56 = vpop.f32.mrf.mxu3 }
  0xfc   :  { %v479_v59 = vadd.f32 %v478_v56, %v1358_v12  ;;  %v984_v56 = vor.u32 %v1045_v24, %v981_v19 }
  0xfd   :  { %v436_v60 = vpop.f32.mrf.mxu0 }
  0xfe   :  { %v512_v0 = vmax.f32 %v479_v59, 0.0  ;;  %v437_v4 = vadd.f32 %v436_v60, %v1341_v6  ;;  %v494_v6 = vmax.f32 %v434_v32, 0.0  ;;  %v1046_v59 = vld [vmem:[%s1568_s3 + $0x24] sm:$0xf0]  ;;  %v1003_v32 = vld [vmem:[%s1568_s3 + $0x50] sm:$0xf] }
  0xff   :  { %v980_v60 = vor.u32 %v1046_v59, %v979_v57 }
 0x100   :  { %v544_v3 = vpack.c.bf16 %v512_v0, %v511_v63  ;;  %v495_v37 = vmax.f32 %v437_v4, 0.0  ;;  %v535_v16 = vpack.c.bf16 %v494_v6, %v493_v22  ;;  %v989_v63 = vld [vmem:[%s1568_s3 + $0x38] sm:$0xf0]  ;;  %v1050_v4 = vld [vmem:[%s1568_s3 + $0x44] sm:$0xf0]  ;;  %v1507_v26 = vpop.permute.xlu2 %623 }
 0x101   :  { %v992_v0 = vor.u32 %v1047_v62, %v989_v63  ;;  %v1054_v6 = vld [vmem:[%s1568_s3 + $0x64] sm:$0xf0] }
 0x102   :  { %770 = vmatpush.bf16.msra.mxu2 %v544_v3  ;;  %v988_v3 = vor.u32 %v1048_v2, %v987_v1 }
 0x105   :  { %v438_v12 = vpop.f32.mrf.mxu0 }
 0x106   :  { %v439_v20 = vadd.f32 %v438_v12, %v1360_v13  ;;  %771 = vmatpush.bf16.msra.mxu2 %v543_v27  ;;  %v424_v13 = vadd.f32 %v423_v48, %v1384_v31  ;;  %v996_v27 = vor.u32 %v1050_v4, %v995_v18  ;;  %v1051_v12 = vld [vmem:[%s1568_s3 + $0x54] sm:$0xf] }
 0x107   :  { %v1008_v61 = vor.u32 %v1051_v12, %v1005_v30 }
 0x108   :  { %v496_v38 = vmax.f32 %v439_v20, 0.0  ;;  %v490_v33 = vmax.f32 %v424_v13, 0.0  ;;  %v1052_v20 = vld [vmem:[%s1568_s3 + $0x54] sm:$0xf0]  ;;  %v1517_v22 = vpop.permute.xlu2 %608 }
 0x109   :  { %v1004_v11 = vor.u32 %v1052_v20, %v1003_v32 }
 0x10a   :  { %772 = vmatpush.bf16.msra.mxu2 %v542_v39  ;;  %v536_v41 = vpack.c.bf16 %v496_v38, %v495_v37  ;;  %v533_v31 = vpack.c.bf16 %v490_v33, %v489_v36  ;;  %v1053_v37 = vld [vmem:[%s1568_s3 + $0x64] sm:$0xf]  ;;  %v1013_v38 = vld [vmem:[%s1568_s3 + $0x68] sm:$0xf0]  ;;  %v1056_v33 = vld [vmem:[%s1568_s3 + $0x74] sm:$0xf0]  ;;  %v1535_v36 = vpop.permute.xlu0 %618 }
 0x10b   :  { %v1016_v39 = vor.u32 %v1053_v37, %v1013_v38 }
 0x10c   :  { %721 = vmatpush.bf16.msra.mxu1 %v536_v41  ;;  %v1012_v41 = vor.u32 %v1054_v6, %v1011_v40 }
 0x10d   :  { %v441_v42 = vpop.f32.mrf.mxu0 }
 0x10e   :  { %773 = vmatpush.bf16.msra.mxu2 %v541_v15  ;;  %v442_v49 = vadd.f32 %v441_v42, %v1394_v10  ;;  %v1055_v15 = vld [vmem:[%s1568_s3 + $0x74] sm:$0xf]  ;;  %v1021_v42 = vld [vmem:[%s1568_s3 + $0x78] sm:$0xf0] }
 0x10f   :  { %v1024_v13 = vor.u32 %v1055_v15, %v1021_v42 }
 0x110   :  { %722 = vmatpush.bf16.msra.mxu1 %v535_v16  ;;  %v497_v52 = vmax.f32 %v442_v49, 0.0  ;;  %v1527_v16 = vpop.permute.xlu1 %613  ;;  %v594_v44 = vpop.permute.xlu2 %593 }
 0x112   :  { %774 = vmatpush.bf16.msra.mxu2 %v1392_v9  ;;  %v965_v9 = vld [vmem:[%s1568_s3 + $0x8] sm:$0xf0]  ;;  %v604_v49 = vpop.permute.xlu0 %603 }
 0x113   :  { %v968_v46 = vor.u32 %v1041_v23, %v965_v9 }
 0x114   :  { %723 = vmatpush.bf16.msra.mxu1 %v534_v17  ;;  %v1020_v17 = vor.u32 %v1056_v33, %v1019_v45 }
 0x115   :  { %v443_v35 = vpop.f32.mrf.mxu0 }
 0x116   :  { %v444_v51 = vadd.f32 %v443_v35, %v187_v21  ;;  %775 = vmatpush.bf16.msra.mxu2 %v1386_v50  ;;  %v963_v50 = vld [vmem:[%s1568_s3] sm:$0xf] }
 0x118   :  { %v498_v48 = vmax.f32 %v444_v51, 0.0  ;;  %724 = vmatpush.bf16.msra.mxu1 %v533_v31  ;;  %v599_v21 = vpop.permute.xlu1 %598  ;;  %v579_v35 = vpop.permute.xlu2 %578 }
 0x11a   :  { %776 = vmatpush.bf16.msra.mxu2 %v1390_v7  ;;  %v537_v10 = vpack.c.bf16 %v498_v48, %v497_v52  ;;  %v1042_v7 = vld [vmem:[%s1568_s3 + $0x4] sm:$0xf0] }
 0x11b   :  { %v964_v53 = vor.u32 %v1042_v7, %v963_v50 }
 0x11c   :  { %725 = vmatpush.bf16.msra.mxu1 %v1399_v43  ;;  %v1043_v43 = vld [vmem:[%s1568_s3 + $0x14] sm:$0xf] }
 0x11e   :  { %777 = vmatpush.bf16.msra.mxu2 %v537_v10 }
 0x120   :  { %726 = vmatpush.bf16.msra.mxu1 %v1388_v58  ;;  %v973_v58 = vld [vmem:[%s1568_s3 + $0x18] sm:$0xf0]  ;;  %v584_v31 = vpop.permute.xlu1 %583  ;;  %v564_v48 = vpop.permute.xlu2 %563 }
 0x121   :  { %778 = vmatmul.bf16.vlgmr.msra.gmra.mxu2 %v968_v46  ;;  %v589_v46 = vpop.permute.xlu0 %588 }
 0x124   :  { %727 = vmatpush.bf16.msra.mxu1 %v1396_v29  ;;  %v976_v29 = vor.u32 %v1043_v43, %v973_v58 }
 0x128   :  { %728 = vmatpush.bf16.msra.mxu1 %v1401_v47  ;;  %v972_v47 = vor.u32 %v1044_v55, %v971_v54  ;;  %v569_v50 = vpop.permute.xlu1 %568 }
 0x12b   :  { %729 = vmatmul.bf16.vlgmr.msra.gmra.mxu1 %v964_v53 }
 0x131   :  { %783 = vmatmul.bf16.gmra.mxu2 %v976_v29  ;;  %v574_v29 = vpop.permute.xlu0 %573 }
 0x13b   :  { %734 = vmatmul.bf16.gmra.mxu1 %v972_v47 }
 0x141   :  { %788 = vmatmul.bf16.gmra.mxu2 %v984_v56 }
 0x14b   :  { %739 = vmatmul.bf16.gmra.mxu1 %v980_v60 }
 0x151   :  { %793 = vmatmul.bf16.gmra.mxu2 %v992_v0 }
 0x15b   :  { %744 = vmatmul.bf16.gmra.mxu1 %v988_v3 }
 0x161   :  { %798 = vmatmul.bf16.gmra.mxu2 %v1000_v5 }
 0x16b   :  { %749 = vmatmul.bf16.gmra.mxu1 %v996_v27 }
 0x171   :  { %803 = vmatmul.bf16.gmra.mxu2 %v1008_v61 }
 0x17b   :  { %754 = vmatmul.bf16.gmra.mxu1 %v1004_v11 }
 0x181   :  { %808 = vmatmul.bf16.gmra.mxu2 %v1016_v39 }
 0x18b   :  { %759 = vmatmul.bf16.gmra.mxu1 %v1012_v41 }
 0x191   :  { %813 = vmatmul.bf16.gmra.mxu2 %v1024_v13 }
 0x19b   :  { %764 = vmatmul.bf16.gmra.mxu1 %v1020_v17 }
 0x1a4   :  { %v779_v51 = vpop.f32.mrf.mxu2 }
 0x1a8   :  { %v730_v52 = vpop.f32.mrf.mxu1 }
 0x1a9   :  { %v731_v23 = vadd.f32 %v730_v52, %v564_v48 }
 0x1ab   :  { %v1537_v9 = vadd.f32 %v779_v51, %v731_v23 }
 0x1ac   :  { %v781_v10 = vpop.f32.mrf.mxu2 }
 0x1b0   :  { %v732_v7 = vpop.f32.mrf.mxu1 }
 0x1b1   :  { %v733_v53 = vadd.f32 %v732_v7, %v569_v50 }
 0x1b3   :  { %v1539_v43 = vadd.f32 %v781_v10, %v733_v53 }
 0x1b4   :  { %v784_v58 = vpop.f32.mrf.mxu2 }
 0x1b8   :  { %v735_v54 = vpop.f32.mrf.mxu1 }
 0x1b9   :  { %v736_v55 = vadd.f32 %v735_v54, %v574_v29 }
 0x1bb   :  { %v1541_v47 = vadd.f32 %v784_v58, %v736_v55 }
 0x1bc   :  { %v786_v24 = vpop.f32.mrf.mxu2 }
 0x1c0   :  { %v737_v19 = vpop.f32.mrf.mxu1 }
 0x1c1   :  { %v738_v56 = vadd.f32 %v737_v19, %v579_v35 }
 0x1c3   :  { %v1543_v57 = vadd.f32 %v786_v24, %v738_v56 }
 0x1c4   :  { %v789_v59 = vpop.f32.mrf.mxu2 }
 0x1c8   :  { %v740_v60 = vpop.f32.mrf.mxu1 }
 0x1c9   :  { %v741_v62 = vadd.f32 %v740_v60, %v584_v31  ;;  %v821_v60 = vmax.f32 %v1541_v47, 0.0 }
 0x1cb   :  { %v1545_v63 = vadd.f32 %v789_v59, %v741_v62  ;;  %v822_v59 = vmax.f32 %v1543_v57, 0.0  ;;  %v820_v62 = vmax.f32 %v1539_v43, 0.0 }
 0x1cc   :  { %v791_v0 = vpop.f32.mrf.mxu2 }
 0x1cd   :  { %v823_v56 = vmax.f32 %v1545_v63, 0.0 }
 0x1d0   :  { %v742_v1 = vpop.f32.mrf.mxu1 }
 0x1d1   :  { %v743_v2 = vadd.f32 %v742_v1, %v589_v46  ;;  %v835_v1 = vld [vmem:[%s1570_s5] sm:$0x1] }
 0x1d3   :  { %v792_v3 = vadd.f32 %v791_v0, %v743_v2  ;;  %v819_v0 = vmax.f32 %v1537_v9, 0.0  ;;  %v840_v2 = vpop.permute.xlu0 %839 }
 0x1d4   :  { %v794_v8 = vpop.f32.mrf.mxu2  ;;  %v842_v47 = vperm.slane %v840_v2, 0 }
 0x1d8   :  { %v745_v14 = vpop.f32.mrf.mxu1 }
 0x1d9   :  { %v746_v5 = vadd.f32 %v745_v14, %v594_v44 }
 0x1db   :  { %v795_v18 = vadd.f32 %v794_v8, %v746_v5 }
 0x1dc   :  { %v796_v4 = vpop.f32.mrf.mxu2 }
 0x1dd   :  { %v825_v19 = vmax.f32 %v795_v18, 0.0 }
 0x1e0   :  { %v747_v27 = vpop.f32.mrf.mxu1 }
 0x1e1   :  { %v748_v12 = vadd.f32 %v747_v27, %v599_v21 }
 0x1e3   :  { %v797_v30 = vadd.f32 %v796_v4, %v748_v12 }
 0x1e4   :  { %v799_v61 = vpop.f32.mrf.mxu2 }
 0x1e5   :  { %v826_v24 = vmax.f32 %v797_v30, 0.0 }
 0x1e8   :  { %v750_v32 = vpop.f32.mrf.mxu1 }
 0x1e9   :  { %v751_v20 = vadd.f32 %v750_v32, %v604_v49 }
 0x1eb   :  { %v800_v11 = vadd.f32 %v799_v61, %v751_v20 }
 0x1ec   :  { %v801_v37 = vpop.f32.mrf.mxu2 }
 0x1f0   :  { %v752_v38 = vpop.f32.mrf.mxu1 }
 0x1f4   :  { %v804_v39 = vpop.f32.mrf.mxu2 }
 0x1f8   :  { %v755_v40 = vpop.f32.mrf.mxu1 }
 0x1f9   :  { %v756_v50 = vadd.f32 %v755_v40, %v1527_v16  ;;  %v827_v16 = vmax.f32 %v800_v11, 0.0 }
 0x1fb   :  { %v805_v29 = vadd.f32 %v804_v39, %v756_v50 }
 0x1fc   :  { %v806_v6 = vpop.f32.mrf.mxu2 }
 0x200   :  { %v757_v41 = vpop.f32.mrf.mxu1 }
 0x201   :  { %v758_v23 = vadd.f32 %v757_v41, %v1535_v36  ;;  %v829_v36 = vmax.f32 %v805_v29, 0.0 }
 0x203   :  { %v807_v58 = vadd.f32 %v806_v6, %v758_v23 }
 0x204   :  { %v809_v15 = vpop.f32.mrf.mxu2 }
 0x208   :  { %v760_v42 = vpop.f32.mrf.mxu1 }
 0x209   :  { %v761_v31 = vadd.f32 %v760_v42, %v1507_v26  ;;  %v830_v26 = vmax.f32 %v807_v58, 0.0 }
 0x20b   :  { %v810_v53 = vadd.f32 %v809_v15, %v761_v31 }
 0x20c   :  { %v811_v13 = vpop.f32.mrf.mxu2 }
 0x210   :  { %v762_v45 = vpop.f32.mrf.mxu1 }
 0x211   :  { %v763_v35 = vadd.f32 %v762_v45, %v1515_v25 }
 0x213   :  { %v812_v46 = vadd.f32 %v811_v13, %v763_v35 }
 0x214   :  { %v814_v44 = vpop.f32.mrf.mxu2 }
 0x215   :  { %v832_v25 = vmax.f32 %v812_v46, 0.0 }
 0x218   :  { %v765_v33 = vpop.f32.mrf.mxu1 }
 0x219   :  { %v766_v17 = vadd.f32 %v765_v33, %v1525_v28  ;;  %v753_v28 = vadd.f32 %v752_v38, %v1517_v22  ;;  %v824_v22 = vmax.f32 %v792_v3, 0.0 }
 0x21b   :  { %v815_v52 = vadd.f32 %v814_v44, %v766_v17  ;;  %v802_v54 = vadd.f32 %v801_v37, %v753_v28 }
 0x21c   :  { %v816_v51 = vpop.f32.mrf.mxu2 }
 0x21d   :  { %v833_v7 = vmax.f32 %v815_v52, 0.0  ;;  %v828_v55 = vmax.f32 %v802_v54, 0.0 }
 0x220   :  { %v767_v21 = vpop.f32.mrf.mxu1 }
 0x221   :  { %v768_v49 = vadd.f32 %v767_v21, %v1499_v34  ;;  %v831_v34 = vmax.f32 %v810_v53, 0.0 }
 0x223   :  { %v817_v48 = vadd.f32 %v816_v51, %v768_v49 }
 0x225   :  { %v834_v10 = vmax.f32 %v817_v48, 0.0 }
 0x227   :  { %843 = vmatpush.msrb.mxu3 %v834_v10 }
 0x229   :  { %844 = vmatpush.msrb.mxu3 %v833_v7 }
 0x22b   :  { %845 = vmatpush.msrb.mxu3 %v832_v25 }
 0x22d   :  { %846 = vmatpush.msrb.mxu3 %v831_v34 }
 0x22f   :  { %847 = vmatpush.msrb.mxu3 %v830_v26 }
 0x231   :  { %848 = vmatpush.msrb.mxu3 %v829_v36 }
 0x233   :  { %849 = vmatpush.msrb.mxu3 %v828_v55 }
 0x235   :  { %850 = vmatpush.msrb.mxu3 %v827_v16 }
 0x237   :  { %851 = vmatpush.msrb.mxu3 %v826_v24 }
 0x239   :  { %852 = vmatpush.msrb.mxu3 %v825_v19 }
 0x23b   :  { %853 = vmatpush.msrb.mxu3 %v824_v22 }
 0x23d   :  { %854 = vmatpush.msrb.mxu3 %v823_v56 }
 0x23f   :  { %855 = vmatpush.msrb.mxu3 %v822_v59 }
 0x241   :  { %856 = vmatpush.msrb.mxu3 %v821_v60 }
 0x243   :  { %857 = vmatpush.msrb.mxu3 %v820_v62 }
 0x245   :  { %858 = vmatpush.msrb.mxu3 %v819_v0 }
 0x246   :  { %859 = vmatmul.f32.vlgmr.msrb.gmra.mxu3 %v835_v1 }
 0x2c9   :  { %v860_v57 = vpop.f32.mrf.mxu3 }
 0x2ca   :  { %v861_v43 = vadd.f32 %v860_v57, %v842_v47 }
 0x2cc   :  { %864 = vst.msk [vmem:[#allocation3] sm:$0x1] %vm863_vm2, %v861_v43 }
 0x2cd   :  { %875 = dma.vmem_to_hbm [thread:$0]  %s871_s17, 16, %s873_s0, [#allocation4]  }
 0x2ce   :  { %1088 = dma.done.wait [#allocation4], 16  }
 0x2cf   :  { %1089 = vsyncadd [#allocation4], 4294967280 }
 0x2d0   :  { %880 = vsyncpa [#allocation4], 1 }

</bundles_post_ra>
